<compile_context>
chip_gen: v5e
topology: v5e:2x2
jax: 0.10.0
libtpu: 0.0.40
codegen_flags: <defaults>
</compile_context>

<pallas_src>
import functools

import jax
import jax.numpy as jnp
from jax.experimental import pallas as pl
from jax.experimental.pallas import tpu as pltpu

# Module-level constants implied by the reference code.
N_INPUT = 8
N_HIDDEN = 32
N_OUTPUT = 4

# Lane-aligned batch tile.  2048 keeps (2 x-bufs + 2 out-bufs + weights)
# well under 1 MiB of VMEM -> safe on v5e (16 MiB scoped), v6e and v7x.
_TILE_B_MAX = 2048


def _round_up(x, m):
    return ((x + m - 1) // m) * m


def _mlp_kernel(xT_ref, w1_ref, b1_ref, w2_ref, b2_ref, oT_ref):
    # xT_ref : (N_INPUT,  TILE_B)  VMEM   -- batch on lanes
    # w1_ref : (H, N_INPUT)        VMEM   -- PyTorch (out, in) layout as-is
    # b1_ref : (H, 1)              VMEM   -- column, broadcast across lanes
    # w2_ref : (N_OUTPUT, H)       VMEM
    # b2_ref : (N_OUTPUT, 1)       VMEM
    # oT_ref : (N_OUTPUT, TILE_B)  VMEM   -- lane-dense output tile
    xT = xT_ref[...].astype(jnp.float32)

    h = jnp.dot(w1_ref[...], xT, preferred_element_type=jnp.float32)  # (H, TILE_B)
    h = jax.nn.sigmoid(h + b1_ref[...])

    y = jnp.dot(w2_ref[...], h, preferred_element_type=jnp.float32)   # (N_OUT, TILE_B)
    y = jax.nn.sigmoid(y + b2_ref[...])

    oT_ref[...] = y.astype(oT_ref.dtype)


def prepare_params(w1, b1, w2, b2):
    """One-time parameter prep (hoisted out of the per-call forward).

    PyTorch nn.Linear weights are already (out_features, in_features), which
    is exactly the W @ x^T orientation the kernel uses, so weights pass
    through untouched; biases become column vectors.
    """
    return w1, b1.reshape(-1, 1), w2, b2.reshape(-1, 1)


@functools.partial(jax.jit, static_argnames=("tile_b",))
def mlp_forward(x, w1, b1_col, w2, b2_col, tile_b=None):
    """Forward pass of the two-layer sigmoid MLP.

    x      : (B, N_INPUT)      float32
    w1     : (H, N_INPUT)      float32   (PyTorch layout, unchanged)
    b1_col : (H, 1)            float32
    w2     : (N_OUTPUT, H)     float32
    b2_col : (N_OUTPUT, 1)     float32
    returns (B, N_OUTPUT)      float32
    """
    B, n_in = x.shape
    H = w1.shape[0]
    n_out = w2.shape[0]

    if tile_b is None:
        tile_b = min(_TILE_B_MAX, _round_up(B, 128))
    b_pad = _round_up(B, tile_b)
    grid = (b_pad // tile_b,)

    # Batch onto the lane axis; pad to a whole number of tiles (XLA fuses
    # this transpose+pad with the surrounding program under jit).
    xT = jnp.transpose(x)                               # (n_in, B)
    if b_pad != B:
        xT = jnp.pad(xT, ((0, 0), (0, b_pad - B)))

    oT = pl.pallas_call(
        _mlp_kernel,
        out_shape=jax.ShapeDtypeStruct((n_out, b_pad), x.dtype),
        grid_spec=pltpu.PrefetchScalarGridSpec(
            num_scalar_prefetch=0,
            grid=grid,
            in_specs=[
                # batch-tiled activation stream (double-buffered by Pallas)
                pl.BlockSpec((n_in, tile_b), lambda i: (0, i)),
                # weights / biases: constant index -> stay resident in VMEM
                pl.BlockSpec((H, n_in), lambda i: (0, 0)),
                pl.BlockSpec((H, 1), lambda i: (0, 0)),
                pl.BlockSpec((n_out, H), lambda i: (0, 0)),
                pl.BlockSpec((n_out, 1), lambda i: (0, 0)),
            ],
            out_specs=pl.BlockSpec((n_out, tile_b), lambda i: (0, i)),
        ),
        compiler_params=pltpu.CompilerParams(
            dimension_semantics=("parallel",),
        ),
    )(xT, w1, b1_col, w2, b2_col)

    return jnp.transpose(oT[:, :B])                     # (B, n_out)


def _reference(x, w1, b1, w2, b2):
    h = jax.nn.sigmoid(x @ w1.T + b1)
    return jax.nn.sigmoid(h @ w2.T + b2)


if __name__ == "__main__":
    key = jax.random.PRNGKey(0)
    k_x, k_w1, k_b1, k_w2, k_b2, k_x2 = jax.random.split(key, 6)

    # Deterministic "PyTorch-style" init (uniform in +/- 1/sqrt(fan_in)).
    bound1 = 1.0 / jnp.sqrt(N_INPUT)
    bound2 = 1.0 / jnp.sqrt(N_HIDDEN)
    w1 = jax.random.uniform(k_w1, (N_HIDDEN, N_INPUT), jnp.float32, -bound1, bound1)
    b1 = jax.random.uniform(k_b1, (N_HIDDEN,), jnp.float32, -bound1, bound1)
    w2 = jax.random.uniform(k_w2, (N_OUTPUT, N_HIDDEN), jnp.float32, -bound2, bound2)
    b2 = jax.random.uniform(k_b2, (N_OUTPUT,), jnp.float32, -bound2, bound2)

    # One-time parameter prep (no per-call transposes).
    w1_p, b1_p, w2_p, b2_p = prepare_params(w1, b1, w2, b2)

    # --- small batch (matches the module's typical use) ---
    batch = 2
    x = jax.random.normal(k_x, (batch, N_INPUT), dtype=jnp.float32)
    out = mlp_forward(x, w1_p, b1_p, w2_p, b2_p)
    jax.block_until_ready(out)
    ref = _reference(x, w1, b1, w2, b2)
    assert out.shape == (batch, N_OUTPUT)
    assert jnp.allclose(out, ref, atol=1e-5, rtol=1e-5)

    # --- larger, non-tile-aligned batch: exercises multi-step grid + padding ---
    batch2 = 300
    x2 = jax.random.normal(k_x2, (batch2, N_INPUT), dtype=jnp.float32)
    out2 = mlp_forward(x2, w1_p, b1_p, w2_p, b2_p, tile_b=128)  # grid = (3,)
    jax.block_until_ready(out2)
    ref2 = _reference(x2, w1, b1, w2, b2)
    assert out2.shape == (batch2, N_OUTPUT)
    assert jnp.allclose(out2, ref2, atol=1e-5, rtol=1e-5)

    print("KERNEL_OK")
</pallas_src>

<mosaic_0001>
module attributes {stable_mosaic.version = 11 : i64} {
  func.func @_mlp_kernel(%arg0: i32, %arg1: memref<8x128xf32, #tpu.memory_space<vmem>>, %arg2: memref<32x8xf32, #tpu.memory_space<vmem>>, %arg3: memref<32x1xf32, #tpu.memory_space<vmem>>, %arg4: memref<4x32xf32, #tpu.memory_space<vmem>>, %arg5: memref<4x1xf32, #tpu.memory_space<vmem>>, %arg6: memref<4x128xf32, #tpu.memory_space<vmem>>) attributes {dimension_semantics = [#tpu.dimension_semantics<parallel>], iteration_bounds = array<i64: 1>, scalar_prefetch = 0 : i64, scratch_operands = 0 : i64, tpu.core_type = #tpu.core_type<tc>, window_params = [{transform_indices = @transform_0, window_bounds = array<i64: 8, 128>}, {pipeline_mode = #tpu.pipeline_mode<synchronous>, transform_indices = @transform_1, window_bounds = array<i64: 32, 8>}, {pipeline_mode = #tpu.pipeline_mode<synchronous>, transform_indices = @transform_2, window_bounds = array<i64: 32, 1>}, {pipeline_mode = #tpu.pipeline_mode<synchronous>, transform_indices = @transform_3, window_bounds = array<i64: 4, 32>}, {pipeline_mode = #tpu.pipeline_mode<synchronous>, transform_indices = @transform_4, window_bounds = array<i64: 4, 1>}, {transform_indices = @transform_5, window_bounds = array<i64: 4, 128>}]} {
    %c0 = arith.constant 0 : index
    %c0_0 = arith.constant 0 : index
    %0 = vector.load %arg1[%c0, %c0_0] : memref<8x128xf32, #tpu.memory_space<vmem>>, vector<8x128xf32>
    %c0_1 = arith.constant 0 : index
    %c0_2 = arith.constant 0 : index
    %1 = vector.load %arg2[%c0_1, %c0_2] : memref<32x8xf32, #tpu.memory_space<vmem>>, vector<32x8xf32>
    %cst = arith.constant dense<0.000000e+00> : vector<32x128xf32>
    %2 = tpu.matmul %1, %0, %cst {dimension_numbers = #tpu.dot_dimension_numbers<[1], [0], [0], [1], [0, 0, 1, 1], [], []>} : vector<32x8xf32>, vector<8x128xf32>, vector<32x128xf32> -> vector<32x128xf32>
    %c0_3 = arith.constant 0 : index
    %c0_4 = arith.constant 0 : index
    %3 = vector.load %arg3[%c0_3, %c0_4] : memref<32x1xf32, #tpu.memory_space<vmem>>, vector<32x1xf32>
    %4 = vector.broadcast %3 : vector<32x1xf32> to vector<32x128xf32>
    %5 = arith.addf %2, %4 : vector<32x128xf32>
    %6 = arith.negf %5 : vector<32x128xf32>
    %7 = math.exp %6 : vector<32x128xf32>
    %cst_5 = arith.constant 1.000000e+00 : f32
    %8 = vector.broadcast %cst_5 : f32 to vector<32x128xf32>
    %9 = arith.addf %8, %7 : vector<32x128xf32>
    %10 = arith.divf %8, %9 : vector<32x128xf32>
    %c0_6 = arith.constant 0 : index
    %c0_7 = arith.constant 0 : index
    %11 = vector.load %arg4[%c0_6, %c0_7] : memref<4x32xf32, #tpu.memory_space<vmem>>, vector<4x32xf32>
    %cst_8 = arith.constant dense<0.000000e+00> : vector<4x128xf32>
    %12 = tpu.matmul %11, %10, %cst_8 {dimension_numbers = #tpu.dot_dimension_numbers<[1], [0], [0], [1], [0, 0, 1, 1], [], []>} : vector<4x32xf32>, vector<32x128xf32>, vector<4x128xf32> -> vector<4x128xf32>
    %c0_9 = arith.constant 0 : index
    %c0_10 = arith.constant 0 : index
    %13 = vector.load %arg5[%c0_9, %c0_10] : memref<4x1xf32, #tpu.memory_space<vmem>>, vector<4x1xf32>
    %14 = vector.broadcast %13 : vector<4x1xf32> to vector<4x128xf32>
    %15 = arith.addf %12, %14 : vector<4x128xf32>
    %16 = arith.negf %15 : vector<4x128xf32>
    %17 = math.exp %16 : vector<4x128xf32>
    %cst_11 = arith.constant 1.000000e+00 : f32
    %18 = vector.broadcast %cst_11 : f32 to vector<4x128xf32>
    %19 = arith.addf %18, %17 : vector<4x128xf32>
    %20 = arith.divf %18, %19 : vector<4x128xf32>
    %c0_12 = arith.constant 0 : index
    %c0_13 = arith.constant 0 : index
    %21 = vector.load %arg6[%c0_12, %c0_13] : memref<4x128xf32, #tpu.memory_space<vmem>>, vector<4x128xf32>
    tpu.vector_store %arg6[%c0_12, %c0_13], %20 {strides = array<i32>} : memref<4x128xf32, #tpu.memory_space<vmem>>, vector<4x128xf32>,
    return
  }
  func.func @transform_0(%arg0: i32) -> (i32, i32) {
    %c0_i32 = arith.constant 0 : i32
    %c0_i32_0 = arith.constant 0 : i32
    return %c0_i32, %arg0 : i32, i32
  }
  func.func @transform_1(%arg0: i32) -> (i32, i32) {
    %c0_i32 = arith.constant 0 : i32
    %c0_i32_0 = arith.constant 0 : i32
    %c0_i32_1 = arith.constant 0 : i32
    return %c0_i32, %c0_i32_0 : i32, i32
  }
  func.func @transform_2(%arg0: i32) -> (i32, i32) {
    %c0_i32 = arith.constant 0 : i32
    %c0_i32_0 = arith.constant 0 : i32
    %c0_i32_1 = arith.constant 0 : i32
    return %c0_i32, %c0_i32_0 : i32, i32
  }
  func.func @transform_3(%arg0: i32) -> (i32, i32) {
    %c0_i32 = arith.constant 0 : i32
    %c0_i32_0 = arith.constant 0 : i32
    %c0_i32_1 = arith.constant 0 : i32
    return %c0_i32, %c0_i32_0 : i32, i32
  }
  func.func @transform_4(%arg0: i32) -> (i32, i32) {
    %c0_i32 = arith.constant 0 : i32
    %c0_i32_0 = arith.constant 0 : i32
    %c0_i32_1 = arith.constant 0 : i32
    return %c0_i32, %c0_i32_0 : i32, i32
  }
  func.func @transform_5(%arg0: i32) -> (i32, i32) {
    %c0_i32 = arith.constant 0 : i32
    %c0_i32_0 = arith.constant 0 : i32
    return %c0_i32, %arg0 : i32, i32
  }
}

</mosaic_0001>

<bundles_post_ra>
// kernel: mlp_forward.1
= control target key start
LH: loop header
LB: loop body
LE: loop exit
PB: predicated region body
PF: predicated region fallthrough
CT: control target
= control target key end

     0   :  { %vm49_vm0 = vcmask 64512   ;;  %v258_v3 = vmov 0   ;;  %s358_s0 = inlined_call_operand.vmem [shape: f32[8,128], index: 0, kind: input, shape index: {}]   ;;  %s359_s1 = inlined_call_operand.vmem [shape: f32[32,8], index: 1, kind: input, shape index: {}]   ;;  %s360_s2 = inlined_call_operand.vmem [shape: f32[32,1], index: 2, kind: input, shape index: {}]   ;;  %s361_s4 = inlined_call_operand.vmem [shape: f32[4,1], index: 4, kind: input, shape index: {}]   ;;  %s362_s3 = inlined_call_operand.vmem [shape: f32[4,32], index: 3, kind: input, shape index: {}]   ;;  %s363_s5 = inlined_call_operand.vmem [shape: f32[4,128], index: 5, kind: output, shape index: {}]  }
   0x1   :  { %v20_v0 = vld [vmem:[%s358_s0] sm:$0xff]  ;;  %v22_v2 = vld [vmem:[%s359_s1 + $0x8] sm:$0xff]  ;;  %236 = vset.pattern.permute.xlu1 %v258_v3  ;;  %235 = vset.pattern.permute.xlu0 %v258_v3  ;;  %v24_v4 = vld [vmem:[%s359_s1 + $0x18] sm:$0xff] }
   0x2   :  { %v21_v1 = vld [vmem:[%s359_s1] sm:$0xff]  ;;  %77 = vmatpush.msra.mxu0 %v20_v0  ;;  %232 = vmatpush.msra.mxu2 %v20_v0  ;;  %v26_v5 = vld [vmem:[%s360_s2 + $0x8] sm:$0xff]  ;;  %v28_v6 = vld [vmem:[%s360_s2 + $0x18] sm:$0xff] }
   0x3   :  { %233 = vmatpush.msra.mxu3 %v20_v0  ;;  %222 = vmatmul.msk.f32.vlgmr.msra.gmra.mxu0 %vm49_vm0, %v21_v1  ;;  %v23_v7 = vld [vmem:[%s359_s1 + $0x10] sm:$0xff]  ;;  %v25_v8 = vld [vmem:[%s360_s2] sm:$0xff] }
   0x4   :  { %223 = vmatmul.msk.f32.vlgmr.msra.gmra.mxu2 %vm49_vm0, %v22_v2  ;;  %225 = vmatmul.msk.f32.vlgmr.msra.gmra.mxu3 %vm49_vm0, %v24_v4  ;;  %v27_v9 = vld [vmem:[%s360_s2 + $0x10] sm:$0xff]  ;;  %v168_v31 = vld [vmem:[%s361_s4] sm:$0xf] }
   0x5   :  { %36 = vperm.xlu1 %236, %v26_v5   ;;  %46 = vperm.xlu0 %235, %v28_v6  }
   0x6   :  { %237 = vset.pattern.permute.xlu2 %v258_v3 }
   0x7   :  { %171 = vperm.xlu2 %237, %v168_v31  }
   0xc   :  { %224 = vmatmul.msk.f32.gmra.mxu2 %vm49_vm0, %v23_v7 }
   0xd   :  { %31 = vperm.xlu1 %236, %v25_v8   ;;  %41 = vperm.xlu0 %235, %v27_v9  }
  0x77   :  { %v37_v10 = vpop.permute.xlu1 %36  ;;  %v47_v15 = vpop.permute.xlu0 %46 }
  0x7f   :  { %v32_v11 = vpop.permute.xlu1 %31  ;;  %v42_v24 = vpop.permute.xlu0 %41 }
  0x80   :  { %v79_v12 = vpop.f32.mrf.mxu0 }
  0x81   :  { %v80_v13 = vadd.f32 %v79_v12, %v32_v11  ;;  %v167_v11 = vld [vmem:[%s362_s3] sm:$0xf] }
  0x83   :  { %v226_v14 = vmul.f32 -1.442695, %v80_v13  ;;  %v172_v13 = vpop.permute.xlu2 %171 }
  0x85   :  { %238 = vpow2.f32 %v226_v14 }
  0x87   :  { %v82_v16 = vpop.f32.mrf.mxu2  ;;  %v88_v17 = vpop.f32.mrf.mxu3 }
  0x88   :  { %v83_v18 = vadd.f32 %v82_v16, %v37_v10  ;;  %v89_v19 = vadd.f32 %v88_v17, %v47_v15 }
  0x8a   :  { %v227_v20 = vmul.f32 -1.442695, %v83_v18  ;;  %v229_v21 = vmul.f32 -1.442695, %v89_v19 }
  0x8b   :  { %v239_v22 = vpop.eup %238 }
  0x8c   :  { %240 = vpow2.f32 %v227_v20  ;;  %v320_v23 = vadd.f32 1.0, %v239_v22 }
  0x8d   :  { %242 = vpow2.f32 %v229_v21 }
  0x8e   :  { %244 = vrcp.f32 %v320_v23  ;;  %vm112_vm8 = vweird.f32 %v320_v23  ;;  %v118_v2 = vand.u32 2147483648, %v320_v23  ;;  %v116_v5 = vand.u32 2147483647, %v320_v23 }
  0x8f   :  { %v85_v25 = vpop.f32.mrf.mxu2 }
  0x90   :  { %v86_v26 = vadd.f32 %v85_v25, %v42_v24  ;;  %v119_v10 = vor.u32 1.1754944e-38, %v118_v2  ;;  %vm117_vm0 = vcmp.eq.f32.partialorder %v116_v5, 8.507059e+37 }
  0x92   :  { %v241_v27 = vpop.eup %240  ;;  %v228_v28 = vmul.f32 -1.442695, %v86_v26 }
  0x93   :  { %v243_v29 = vpop.eup %242  ;;  %v323_v30 = vadd.f32 1.0, %v241_v27 }
  0x94   :  { %v106_v32 = vadd.f32 1.0, %v243_v29  ;;  %246 = vpow2.f32 %v228_v28  ;;  %v329_v33 = vpop.eup %244 }
  0x95   :  { %248 = vrcp.f32 %v323_v30  ;;  %v108_v40 = vmul.f32 %v329_v33, %v320_v23  ;;  %vm127_vm7 = vweird.f32 %v323_v30  ;;  %v131_v60 = vand.u32 2147483647, %v323_v30 }
  0x96   :  { %250 = vrcp.f32 %v106_v32  ;;  %v163_v42 = vand.u32 2147483648, %v106_v32  ;;  %v161_v45 = vand.u32 2147483647, %v106_v32  ;;  %vm157_vm2 = vweird.f32 %v106_v32 }
  0x97   :  { %v109_v46 = vsub.f32 1.0, %v108_v40  ;;  %v133_v61 = vand.u32 2147483648, %v323_v30  ;;  %vm113_vm11 = vweird.f32 %v329_v33  ;;  %vm132_vm15 = vcmp.eq.f32.partialorder %v131_v60, 8.507059e+37 }
  0x98   :  { %v164_v49 = vor.u32 1.1754944e-38, %v163_v42  ;;  %vm162_vm4 = vcmp.eq.f32.partialorder %v161_v45, 8.507059e+37  ;;  %vm114_vm14 = vmor %vm112_vm8, %vm113_vm11 }
  0x99   :  { %v110_v55 = vmul.f32 %v329_v33, %v109_v46  ;;  %v134_v7 = vor.u32 1.1754944e-38, %v133_v61 }
  0x9a   :  { %v247_v34 = vpop.eup %246 }
  0x9b   :  { %v249_v35 = vpop.eup %248  ;;  %v105_v36 = vadd.f32 1.0, %v247_v34  ;;  %v111_v0 = vadd.f32 %v329_v33, %v110_v55 }
  0x9c   :  { %v251_v37 = vpop.eup %250  ;;  %v123_v38 = vmul.f32 %v249_v35, %v323_v30  ;;  %vm128_vm5 = vweird.f32 %v249_v35 }
  0x9d   :  { %252 = vrcp.f32 %v105_v36  ;;  %v153_v39 = vmul.f32 %v251_v37, %v106_v32  ;;  %vm158_vm1 = vweird.f32 %v251_v37  ;;  %v148_v56 = vand.u32 2147483648, %v105_v36  ;;  %vm339_vm10 = vmor %vm127_vm7, %vm128_vm5 }
  0x9e   :  { %v124_v43 = vsub.f32 1.0, %v123_v38  ;;  %vm159_vm3 = vmor %vm157_vm2, %vm158_vm1  ;;  %v146_v58 = vand.u32 2147483647, %v105_v36  ;;  %vm142_vm9 = vweird.f32 %v105_v36  ;;  %v115_v8 = vsel %vm114_vm14, %v329_v33, %v111_v0 }
  0x9f   :  { %v154_v41 = vsub.f32 1.0, %v153_v39  ;;  %v149_v1 = vor.u32 1.1754944e-38, %v148_v56  ;;  %vm174_vm1 = vcmask 261120   ;;  %v120_v12 = vsel %vm117_vm0, %v119_v10, %v115_v8 }
  0xa0   :  { %v125_v51 = vmul.f32 %v249_v35, %v124_v43  ;;  %vm147_vm13 = vcmp.eq.f32.partialorder %v146_v58, 8.507059e+37 }
  0xa1   :  { %v155_v44 = vmul.f32 %v251_v37, %v154_v41 }
  0xa2   :  { %v126_v59 = vadd.f32 %v249_v35, %v125_v51 }
  0xa3   :  { %v253_v47 = vpop.eup %252  ;;  %v156_v48 = vadd.f32 %v251_v37, %v155_v44 }
  0xa4   :  { %v138_v50 = vmul.f32 %v253_v47, %v105_v36  ;;  %vm143_vm6 = vweird.f32 %v253_v47  ;;  %v130_v4 = vsel %vm339_vm10, %v249_v35, %v126_v59 }
  0xa5   :  { %v160_v52 = vsel %vm159_vm3, %v251_v37, %v156_v48  ;;  %vm144_vm12 = vmor %vm142_vm9, %vm143_vm6  ;;  %v135_v9 = vsel %vm132_vm15, %v134_v7, %v130_v4 }
  0xa6   :  { %v165_v53 = vsel %vm162_vm4, %v164_v49, %v160_v52  ;;  %v139_v54 = vsub.f32 1.0, %v138_v50 }
  0xa7   :  { %190 = vmatpush.msra.mxu1 %v165_v53 }
  0xa8   :  { %v140_v57 = vmul.f32 %v253_v47, %v139_v54 }
  0xaa   :  { %v141_v62 = vadd.f32 %v253_v47, %v140_v57 }
  0xac   :  { %v145_v3 = vsel %vm144_vm12, %v253_v47, %v141_v62 }
  0xad   :  { %v150_v6 = vsel %vm147_vm13, %v149_v1, %v145_v3 }
  0xae   :  { %191 = vmatpush.msra.mxu1 %v150_v6 }
  0xb0   :  { %192 = vmatpush.msra.mxu1 %v135_v9 }
  0xb2   :  { %193 = vmatpush.msra.mxu1 %v120_v12 }
  0xb3   :  { %230 = vmatmul.msk.f32.vlgmr.msra.gmra.mxu1 %vm174_vm1, %v167_v11 }
 0x130   :  { %v195_v14 = vpop.f32.mrf.mxu1 }
 0x131   :  { %v196_v15 = vadd.f32 %v195_v14, %v172_v13 }
 0x133   :  { %v231_v16 = vmul.f32 -1.442695, %v196_v15 }
 0x135   :  { %254 = vpow2.f32 %v231_v16 }
 0x13b   :  { %v255_v17 = vpop.eup %254 }
 0x13c   :  { %v201_v18 = vadd.f32 1.0, %v255_v17 }
 0x13e   :  { %256 = vrcp.f32 %v201_v18  ;;  %v213_v22 = vand.u32 2147483648, %v201_v18  ;;  %v211_v24 = vand.u32 2147483647, %v201_v18  ;;  %vm207_vm3 = vweird.f32 %v201_v18 }
 0x140   :  { %v214_v26 = vor.u32 1.1754944e-38, %v213_v22  ;;  %vm212_vm5 = vcmp.eq.f32.partialorder %v211_v24, 8.507059e+37 }
 0x144   :  { %v257_v19 = vpop.eup %256 }
 0x145   :  { %v203_v20 = vmul.f32 %v257_v19, %v201_v18  ;;  %vm208_vm2 = vweird.f32 %v257_v19 }
 0x146   :  { %vm209_vm4 = vmor %vm207_vm3, %vm208_vm2 }
 0x147   :  { %v204_v21 = vsub.f32 1.0, %v203_v20 }
 0x149   :  { %v205_v23 = vmul.f32 %v257_v19, %v204_v21 }
 0x14b   :  { %v206_v25 = vadd.f32 %v257_v19, %v205_v23 }
 0x14d   :  { %v210_v27 = vsel %vm209_vm4, %v257_v19, %v206_v25 }
 0x14e   :  { %v215_v28 = vsel %vm212_vm5, %v214_v26, %v210_v27 }
 0x14f   :  { %217 = vst [vmem:[%s363_s5] sm:$0xf] %v215_v28 }

</bundles_post_ra>
